<compile_context>
chip_gen: v7x
topology: tpu7x:2x2x1
jax: 0.10.0
libtpu: 0.0.40
codegen_flags: <defaults>
</compile_context>

<pallas_src>
import jax
import jax.numpy as jnp
from jax import lax
from jax.experimental import pallas as pl
from jax.experimental.pallas import tpu as pltpu


def _round_up(x, m):
    return ((x + m - 1) // m) * m


def _make_kernel(inv_temp, use_const_max, valid_in_last, needs_mask):
    # After normalization all cosine logits are <= 1, so scaled logits are
    # <= 1/temp: use that as a constant logsumexp shift (no running max).
    m_const = float(inv_temp)

    def kernel(q_ref, pos_ref, nT_ref, loss_ref, s_ref, m_ref):
        k = pl.program_id(1)
        nk = pl.num_programs(1)

        # ---- once per query tile: seed the logsumexp state with the positive
        #      logit (already scaled by 1/temp in the wrapper). ----
        @pl.when(k == 0)
        def _init():
            pos = pos_ref[...]                          # (TB, 1) f32
            if use_const_max:
                s_ref[...] = jnp.exp(pos - m_const)
            else:
                m_ref[...] = pos
                s_ref[...] = jnp.ones(s_ref.shape, jnp.float32)

        # ---- per negative tile: canonical (TB,D)x(D,TM) MXU matmul; negatives
        #      are pre-normalized & pre-transposed, 1/temp applied in f32. ----
        logits = jnp.dot(q_ref[...], nT_ref[...],
                         preferred_element_type=jnp.float32) * inv_temp

        if use_const_max:
            def _accum(lg):
                s_ref[...] += jnp.sum(jnp.exp(lg - m_const),
                                      axis=-1, keepdims=True)

            if needs_mask:
                # mask padded columns only on the last tile
                @pl.when(k == nk - 1)
                def _tail():
                    col = lax.broadcasted_iota(jnp.int32, logits.shape, 1)
                    _accum(jnp.where(col < valid_in_last, logits, -1e30))

                @pl.when(k != nk - 1)
                def _body():
                    _accum(logits)
            else:
                _accum(logits)
        else:
            # online-logsumexp fallback (very small temperatures)
            lg = logits
            if needs_mask:
                col = lax.broadcasted_iota(jnp.int32, logits.shape, 1)
                limit = jnp.where(k == nk - 1, valid_in_last, logits.shape[1])
                lg = jnp.where(col < limit, logits, -1e30)
            m_prev = m_ref[...]
            m_new = jnp.maximum(m_prev, jnp.max(lg, axis=-1, keepdims=True))
            alpha = jnp.exp(m_prev - m_new)
            s_ref[...] = alpha * s_ref[...] + jnp.sum(
                jnp.exp(lg - m_new), axis=-1, keepdims=True)
            m_ref[...] = m_new

        # ---- finalize: per-sample loss = logsumexp - pos_logit ----
        @pl.when(k == nk - 1)
        def _finalize():
            base = m_const if use_const_max else m_ref[...]
            lse = base + jnp.log(s_ref[...])
            loss_ref[...] = lse - pos_ref[...]

    return kernel


def info_nce_pallas(query, pos, neg, temp, reduction="mean",
                    block_b=1024, block_m=512):
    """InfoNCE loss matching torch info_nce(query, pos, neg, temp, reduction)."""
    assert query.ndim == 2 and pos.shape == query.shape
    assert neg.ndim == 2 and neg.shape[1] == query.shape[1]
    B, D = query.shape
    M = neg.shape[0]
    inv_temp = float(1.0 / temp)
    # Constant-max shift is safe unless temp is tiny (exp underflow); then use
    # the online running max.
    use_const_max = inv_temp <= 30.0

    # bf16 inputs feed the MXU in bf16; normalization / logit / LSE math is f32.
    mxu_dtype = (jnp.bfloat16
                 if (query.dtype == jnp.bfloat16 and neg.dtype == jnp.bfloat16)
                 else jnp.float32)
    in_bytes = jnp.dtype(mxu_dtype).itemsize

    # --- one-pass wrapper-side prep (cheap O((B+M)*D) vs the O(B*M*D) matmul):
    #     normalize q / pos / neg once, compute the positive logit, transpose
    #     the negatives to (D, M) so the kernel runs a canonical MXU matmul. ---
    eps = 1e-12  # F.normalize: x / max(||x||, eps)
    def _normalize(x):
        x = x.astype(jnp.float32)
        nrm = jnp.sqrt(jnp.sum(x * x, axis=-1, keepdims=True))
        return x / jnp.maximum(nrm, eps)

    qn = _normalize(query)
    pn = _normalize(pos)
    nn = _normalize(neg)
    pos_logits = jnp.sum(qn * pn, axis=-1, keepdims=True) * inv_temp   # (B,1) f32
    q_op = qn.astype(mxu_dtype)                                        # (B, D)
    negT = jnp.transpose(nn).astype(mxu_dtype)                         # (D, M)

    # --- tile selection; VMEM budget re-derived per call (48 MiB target is
    #     safe for v7x's 64 MiB per-core VMEM, fine on v5e/v6e's 128 MiB). ---
    TB = min(block_b, _round_up(B, 8))
    TM = min(block_m, _round_up(M, 128))

    def _vmem_bytes(tb, tm):
        return (2 * tb * D * in_bytes          # query tile (double-buffered)
                + 2 * D * tm * in_bytes        # neg^T tile (double-buffered)
                + 2 * tb * 4 + 2 * tb * 4      # pos-logit input + output
                + 2 * tb * 4                   # s/m accumulators
                + 2 * tb * tm * 4)             # (TB,TM) f32 logits/exp temps

    VMEM_BUDGET = 48 << 20
    while _vmem_bytes(TB, TM) > VMEM_BUDGET and TM > 128:
        TM //= 2
    while _vmem_bytes(TB, TM) > VMEM_BUDGET and TB > 128:
        TB = _round_up(TB // 2, 8)

    # Keep both v7x TensorCores busy: ensure >=2 tiles on the "parallel" B axis
    # when the batch is big enough for the split to be worthwhile.
    if B > 256 and _round_up(B, TB) == TB:
        TB = _round_up((B + 1) // 2, 8)

    B_pad = _round_up(B, TB)
    M_pad = _round_up(M, TM)
    nb = B_pad // TB
    nk = M_pad // TM
    needs_mask = (M_pad != M)
    valid_in_last = M - (nk - 1) * TM

    if B_pad != B:
        q_op = jnp.pad(q_op, ((0, B_pad - B), (0, 0)))
        pos_logits = jnp.pad(pos_logits, ((0, B_pad - B), (0, 0)))
    if M_pad != M:
        negT = jnp.pad(negT, ((0, 0), (0, M_pad - M)))

    kernel = _make_kernel(inv_temp, use_const_max, valid_in_last, needs_mask)

    vmem_limit = int(min(max(_vmem_bytes(TB, TM) * 5 // 4, 32 << 20), 60 << 20))

    per_sample = pl.pallas_call(
        kernel,
        out_shape=jax.ShapeDtypeStruct((B_pad, 1), jnp.float32),
        grid_spec=pltpu.PrefetchScalarGridSpec(
            num_scalar_prefetch=0,
            grid=(nb, nk),
            in_specs=[
                pl.BlockSpec((TB, D), lambda i, k: (i, 0)),   # normalized query
                pl.BlockSpec((TB, 1), lambda i, k: (i, 0)),   # pos logits * 1/t
                pl.BlockSpec((D, TM), lambda i, k: (0, k)),   # normalized neg^T
            ],
            out_specs=pl.BlockSpec((TB, 1), lambda i, k: (i, 0)),
            scratch_shapes=[
                pltpu.VMEM((TB, 1), jnp.float32),   # running sum-of-exp
                pltpu.VMEM((TB, 1), jnp.float32),   # running max (fallback path)
            ],
        ),
        compiler_params=pltpu.CompilerParams(
            dimension_semantics=("parallel", "arbitrary"),
            vmem_limit_bytes=vmem_limit),
    )(q_op, pos_logits, negT)

    per_sample = per_sample[:B, 0]
    if reduction == "mean":
        return jnp.mean(per_sample)
    elif reduction == "sum":
        return jnp.sum(per_sample)
    elif reduction == "none":
        return per_sample
    raise ValueError(f"unsupported reduction: {reduction!r}")


class InfoNCE:
    """Mirror of the PyTorch InfoNCE module (no parameters)."""

    def __init__(self, temp, reduction="mean"):
        self.temp = temp
        self.reduction = reduction

    def __call__(self, query, positive, negative):
        return info_nce_pallas(query, positive, negative, self.temp, self.reduction)


def _info_nce_ref(query, pos, neg, temp):
    # Pure-JAX reference for a correctness check.
    eps = 1e-12
    norm = lambda x: x / jnp.maximum(
        jnp.linalg.norm(x, axis=-1, keepdims=True), eps)
    q, p, n = norm(query), norm(pos), norm(neg)
    pos_logits = jnp.sum(q * p, axis=1, keepdims=True)
    neg_logits = q @ n.T
    logits = jnp.concatenate([pos_logits, neg_logits], axis=1) / temp
    lse = jax.scipy.special.logsumexp(logits, axis=1)
    return jnp.mean(lse - logits[:, 0])


if __name__ == "__main__":
    key = jax.random.PRNGKey(0)
    k_q, k_p, k_n = jax.random.split(key, 3)

    B, D, M = 8, 32, 16  # batch, feature dim, number of negatives
    query = jax.random.normal(k_q, (B, D), dtype=jnp.float32)
    pos = jax.random.normal(k_p, (B, D), dtype=jnp.float32)
    neg = jax.random.normal(k_n, (M, D), dtype=jnp.float32)
    temp = 0.1

    module = InfoNCE(temp=temp, reduction="mean")
    loss = module(query, pos, neg)
    loss = jax.block_until_ready(loss)

    ref = _info_nce_ref(query, pos, neg, temp)
    assert jnp.allclose(loss, ref, rtol=1e-4, atol=1e-5), (loss, ref)

    print("KERNEL_OK")
</pallas_src>

<mosaic_0001>
module attributes {stable_mosaic.version = 11 : i64} {
  func.func @kernel(%arg0: i32, %arg1: i32, %arg2: memref<8x32xf32, #tpu.memory_space<vmem>>, %arg3: memref<8x1xf32, #tpu.memory_space<vmem>>, %arg4: memref<32x128xf32, #tpu.memory_space<vmem>>, %arg5: memref<8x1xf32, #tpu.memory_space<vmem>>, %arg6: memref<8x1xf32, #tpu.memory_space<vmem>>, %arg7: memref<8x1xf32, #tpu.memory_space<vmem>>) attributes {dimension_semantics = [#tpu.dimension_semantics<parallel>, #tpu.dimension_semantics<arbitrary>], iteration_bounds = array<i64: 1, 1>, scalar_prefetch = 0 : i64, scratch_operands = 2 : i64, tpu.core_type = #tpu.core_type<tc>, window_params = [{transform_indices = @transform_0, window_bounds = array<i64: 8, 32>}, {transform_indices = @transform_1, window_bounds = array<i64: 8, 1>}, {transform_indices = @transform_2, window_bounds = array<i64: 32, 128>}, {transform_indices = @transform_3, window_bounds = array<i64: 8, 1>}]} {
    %c0_i32 = arith.constant 0 : i32
    %0 = arith.cmpi eq, %arg1, %c0_i32 : i32
    %1 = arith.extui %0 : i1 to i32
    %c0_i32_0 = arith.constant 0 : i32
    %2 = arith.cmpi ne, %1, %c0_i32_0 : i32
    scf.if %2 {
      %c0_11 = arith.constant 0 : index
      %c0_12 = arith.constant 0 : index
      %17 = vector.load %arg3[%c0_11, %c0_12] : memref<8x1xf32, #tpu.memory_space<vmem>>, vector<8x1xf32>
      %cst_13 = arith.constant 1.000000e+01 : f32
      %18 = vector.broadcast %cst_13 : f32 to vector<8x1xf32>
      %19 = arith.subf %17, %18 : vector<8x1xf32>
      %20 = math.exp %19 : vector<8x1xf32>
      %c0_14 = arith.constant 0 : index
      %c0_15 = arith.constant 0 : index
      %21 = vector.load %arg6[%c0_14, %c0_15] : memref<8x1xf32, #tpu.memory_space<vmem>>, vector<8x1xf32>
      tpu.vector_store %arg6[%c0_14, %c0_15], %20 {strides = array<i32>} : memref<8x1xf32, #tpu.memory_space<vmem>>, vector<8x1xf32>,
    } else {
    }
    %c0 = arith.constant 0 : index
    %c0_1 = arith.constant 0 : index
    %3 = vector.load %arg2[%c0, %c0_1] : memref<8x32xf32, #tpu.memory_space<vmem>>, vector<8x32xf32>
    %c0_2 = arith.constant 0 : index
    %c0_3 = arith.constant 0 : index
    %4 = vector.load %arg4[%c0_2, %c0_3] : memref<32x128xf32, #tpu.memory_space<vmem>>, vector<32x128xf32>
    %cst = arith.constant dense<0.000000e+00> : vector<8x128xf32>
    %5 = tpu.matmul %3, %4, %cst {dimension_numbers = #tpu.dot_dimension_numbers<[1], [0], [0], [1], [0, 0, 1, 1], [], []>} : vector<8x32xf32>, vector<32x128xf32>, vector<8x128xf32> -> vector<8x128xf32>
    %cst_4 = arith.constant 1.000000e+01 : f32
    %6 = vector.broadcast %cst_4 : f32 to vector<8x128xf32>
    %7 = arith.mulf %5, %6 : vector<8x128xf32>
    %c0_i32_5 = arith.constant 0 : i32
    %8 = arith.cmpi eq, %arg1, %c0_i32_5 : i32
    %9 = arith.extui %8 : i1 to i32
    %c0_i32_6 = arith.constant 0 : i32
    %10 = arith.cmpi ne, %9, %c0_i32_6 : i32
    scf.if %10 {
      %17 = tpu.iota {dimensions = array<i32: 1>} : vector<8x128xi32>
      %c16_i32 = arith.constant 16 : i32
      %18 = vector.broadcast %c16_i32 : i32 to vector<8x128xi32>
      %19 = arith.cmpi slt, %17, %18 : vector<8x128xi32>
      %cst_11 = arith.constant -1.000000e+30 : f32
      %20 = vector.broadcast %cst_11 : f32 to vector<8x128xf32>
      %21 = arith.select %19, %7, %20 : vector<8x128xi1>, vector<8x128xf32>
      %c0_12 = arith.constant 0 : index
      %c0_13 = arith.constant 0 : index
      %22 = vector.load %arg6[%c0_12, %c0_13] : memref<8x1xf32, #tpu.memory_space<vmem>>, vector<8x1xf32>
      %cst_14 = arith.constant 1.000000e+01 : f32
      %23 = vector.broadcast %cst_14 : f32 to vector<8x128xf32>
      %24 = arith.subf %21, %23 : vector<8x128xf32>
      %25 = math.exp %24 : vector<8x128xf32>
      %cst_15 = arith.constant dense<0.000000e+00> : vector<8xf32>
      %26 = vector.multi_reduction <add>, %25, %cst_15 [1] : vector<8x128xf32> to vector<8xf32>
      %27 = vector.shape_cast %26 : vector<8xf32> to vector<8x1xf32>
      %28 = arith.addf %22, %27 : vector<8x1xf32>
      %c0_16 = arith.constant 0 : index
      %c0_17 = arith.constant 0 : index
      %29 = vector.load %arg6[%c0_16, %c0_17] : memref<8x1xf32, #tpu.memory_space<vmem>>, vector<8x1xf32>
      tpu.vector_store %arg6[%c0_16, %c0_17], %28 {strides = array<i32>} : memref<8x1xf32, #tpu.memory_space<vmem>>, vector<8x1xf32>,
    } else {
    }
    %c0_i32_7 = arith.constant 0 : i32
    %11 = arith.cmpi ne, %arg1, %c0_i32_7 : i32
    %12 = arith.extui %11 : i1 to i32
    %c0_i32_8 = arith.constant 0 : i32
    %13 = arith.cmpi ne, %12, %c0_i32_8 : i32
    scf.if %13 {
      %c0_11 = arith.constant 0 : index
      %c0_12 = arith.constant 0 : index
      %17 = vector.load %arg6[%c0_11, %c0_12] : memref<8x1xf32, #tpu.memory_space<vmem>>, vector<8x1xf32>
      %cst_13 = arith.constant 1.000000e+01 : f32
      %18 = vector.broadcast %cst_13 : f32 to vector<8x128xf32>
      %19 = arith.subf %7, %18 : vector<8x128xf32>
      %20 = math.exp %19 : vector<8x128xf32>
      %cst_14 = arith.constant dense<0.000000e+00> : vector<8xf32>
      %21 = vector.multi_reduction <add>, %20, %cst_14 [1] : vector<8x128xf32> to vector<8xf32>
      %22 = vector.shape_cast %21 : vector<8xf32> to vector<8x1xf32>
      %23 = arith.addf %17, %22 : vector<8x1xf32>
      %c0_15 = arith.constant 0 : index
      %c0_16 = arith.constant 0 : index
      %24 = vector.load %arg6[%c0_15, %c0_16] : memref<8x1xf32, #tpu.memory_space<vmem>>, vector<8x1xf32>
      tpu.vector_store %arg6[%c0_15, %c0_16], %23 {strides = array<i32>} : memref<8x1xf32, #tpu.memory_space<vmem>>, vector<8x1xf32>,
    } else {
    }
    %c0_i32_9 = arith.constant 0 : i32
    %14 = arith.cmpi eq, %arg1, %c0_i32_9 : i32
    %15 = arith.extui %14 : i1 to i32
    %c0_i32_10 = arith.constant 0 : i32
    %16 = arith.cmpi ne, %15, %c0_i32_10 : i32
    scf.if %16 {
      %c0_11 = arith.constant 0 : index
      %c0_12 = arith.constant 0 : index
      %17 = vector.load %arg6[%c0_11, %c0_12] : memref<8x1xf32, #tpu.memory_space<vmem>>, vector<8x1xf32>
      %18 = math.log %17 : vector<8x1xf32>
      %cst_13 = arith.constant 1.000000e+01 : f32
      %19 = vector.broadcast %cst_13 : f32 to vector<8x1xf32>
      %20 = arith.addf %19, %18 : vector<8x1xf32>
      %c0_14 = arith.constant 0 : index
      %c0_15 = arith.constant 0 : index
      %21 = vector.load %arg3[%c0_14, %c0_15] : memref<8x1xf32, #tpu.memory_space<vmem>>, vector<8x1xf32>
      %22 = arith.subf %20, %21 : vector<8x1xf32>
      %c0_16 = arith.constant 0 : index
      %c0_17 = arith.constant 0 : index
      %23 = vector.load %arg5[%c0_16, %c0_17] : memref<8x1xf32, #tpu.memory_space<vmem>>, vector<8x1xf32>
      tpu.vector_store %arg5[%c0_16, %c0_17], %22 {strides = array<i32>} : memref<8x1xf32, #tpu.memory_space<vmem>>, vector<8x1xf32>,
    } else {
    }
    return
  }
  func.func @transform_0(%arg0: i32, %arg1: i32) -> (i32, i32) {
    %c0_i32 = arith.constant 0 : i32
    %c0_i32_0 = arith.constant 0 : i32
    return %arg0, %c0_i32 : i32, i32
  }
  func.func @transform_1(%arg0: i32, %arg1: i32) -> (i32, i32) {
    %c0_i32 = arith.constant 0 : i32
    %c0_i32_0 = arith.constant 0 : i32
    return %arg0, %c0_i32 : i32, i32
  }
  func.func @transform_2(%arg0: i32, %arg1: i32) -> (i32, i32) {
    %c0_i32 = arith.constant 0 : i32
    %c0_i32_0 = arith.constant 0 : i32
    return %c0_i32, %arg1 : i32, i32
  }
  func.func @transform_3(%arg0: i32, %arg1: i32) -> (i32, i32) {
    %c0_i32 = arith.constant 0 : i32
    %c0_i32_0 = arith.constant 0 : i32
    return %arg0, %c0_i32 : i32, i32
  }
}

</mosaic_0001>

<bundles_post_ra>
// kernel: tpu_custom_call.1
= control target key start
LH: loop header
LB: loop body
LE: loop exit
PB: predicated region body
PF: predicated region fallthrough
CT: control target
= control target key end

     0   :  { %8 = vsyncpa [#allocation5], 0  ;;  %s225_s12 = smov [#allocation4]   ;;  %s275_s0 = inlined_call_operand.vmem [shape: f32[8,32], index: 0, kind: input, shape index: {}]   ;;  %s276_s1 = inlined_call_operand.vmem [shape: f32[8,1], index: 1, kind: input, shape index: {}]   ;;  %s277_s2 = inlined_call_operand.hbm [shape: f32[32,128], index: 2, kind: input, shape index: {}]   ;;  %s278_s3 = inlined_call_operand.vmem [shape: f32[8,1], index: 3, kind: output, shape index: {}]  }
   0x1   :  { %s18_s13 = sshll.u32 %s225_s12, 4  ;;  %s201_s16 = scalar_lea.hbm %s277_s2, 512  ;;  %s19_s13 = int_to_ptr.vmem [resolvable:$true] %s18_s13 }
   0x2   :  { %p202_p0 = scmp.ne.s32.totalorder %s277_s2, %s201_s16  ;;  %p205_p1 = scmp.lt.u32.totalorder %s201_s16, %s277_s2 }
   0x4   :  { %p207_p2 = pnand %p205_p1, %p202_p0 }
   0x6   :  { %210 = shalt.err (!%p207_p2)
}
   0x7   :  { %s211_s21 = scalar_lea.vmem %s19_s13, 512  ;;  %p216_p4 = scmp.lt.s32.totalorder %s19_s13, %s19_s13 }
   0x8   :  { %p212_p3 = scmp.ne.s32.totalorder %s19_s13, %s211_s21  ;;  %p217_p5 = scmp.lt.s32.totalorder %s211_s21, %s211_s21 }
   0xa   :  { %p218_p6 = por %p217_p5, %p216_p4 }
   0xc   :  { %p219_p7 = pnand %p218_p6, %p212_p3 }
   0xe   :  { %222 = shalt.err (!%p219_p7)
}
   0xf   :  { %s226_s22 = smov 128   ;;  %s227_s23 = smov 8  }
  0x10   :  { %24 = dma.hbm_to_vmem [thread:$0]  %s277_s2, 512, %s19_s13, [#allocation5], %s226_s22, %s226_s22, %s227_s23  }
  0x11   :  { %223 = dma.done.wait [#allocation5], 512  }
  0x12   :  { %224 = vsyncadd [#allocation5], 4294966784  ;;  %v228_v0 = vmov 0.0|0.0   ;;  %vm229_vm0 = vmmov 0   ;;  %v230_v1 = vmov 0.0   ;;  %v39_v2 = vld [vmem:[#allocation4] sm:$0xff]  ;;  %v121_v13 = vlaneseq }
  0x13   :  { %183 = vmatprep.subr.bf16.mxu0 %v228_v0  ;;  %180 = vmatprep.mubr.msk.f32.mxu0 %vm229_vm0, %v230_v1  ;;  %v40_v3 = vld [vmem:[#allocation4 + $0x8] sm:$0xff]  ;;  %v41_v4 = vld [vmem:[#allocation4 + $0x10] sm:$0xff]  ;;  %v42_v6 = vld [vmem:[#allocation4 + $0x18] sm:$0xff]  ;;  %vm43_vm1 = vcmask 261120   ;;  %vm36_vm2 = vcmask 7168  }
  0x14   :  { %v184_v5 = vpack.c.bf16 %v40_v3, %v39_v2  ;;  %v187_v7 = vpack.c.bf16 %v42_v6, %v41_v4  ;;  %v38_v8 = vld [vmem:[%s275_s0] sm:$0xff]  ;;  %v122_v14 = vand.u32 127, %v121_v13 }
  0x15   :  { %v32_v9 = vld [vmem:[%s276_s1] sm:$0xff] }
  0x16   :  { %185 = vmatpush3.bf16.msra.mxu0 %v184_v5  ;;  %v163_v10 = vadd.f32 -10.0, %v32_v9  ;;  %vm123_vm3 = vcmp.lt.s32.totalorder %v122_v14, 16 }
  0x17   :  { %186 = vmatprep.subr.bf16.mxu0 %v228_v0 }
  0x18   :  { %v34_v11 = vmul.f32 1.442695, %v163_v10 }
  0x1a   :  { %188 = vmatpush3.bf16.msra.mxu0 %v187_v7  ;;  %195 = vpow2.f32 %v34_v11 }
  0x1d   :  { %181 = vmatmul.mubr.msk.f32.vlgmr.msra.gmra.mrb[0].mxu0 %vm43_vm1, %v38_v8 }
  0x24   :  { %v196_v12 = vpop.eup %195 }
  0x25   :  { %37 = vst.msk [vmem:[#allocation2] sm:$0xff] %vm36_vm2, %v196_v12 }
  0x2c   :  { %v125_v22 = vld [vmem:[#allocation2] sm:$0xff] }
  0xf0   :  { %v113_v15 = vpop.f32.mrb[0].mxu0 }
  0xf1   :  { %v117_v16 = vmul.f32 10.0, %v113_v15  ;;  %v182_v17 = vpop.f32.mrb[1].mxu0 }
  0xf3   :  { %v124_v18 = vsel %vm123_vm3, %v117_v16, -1e+30 }
  0xf4   :  { %v165_v19 = vadd.f32 -10.0, %v124_v18 }
  0xf6   :  { %v127_v20 = vmul.f32 1.442695, %v165_v19 }
  0xf8   :  { %197 = vpow2.f32 %v127_v20 }
 0x102   :  { %v198_v21 = vpop.eup %197 }
 0x103   :  { %129 = vadd.xlane.f32.xlu0 %v198_v21 }
 0x190   :  { %v130_v23 = vpop.xlane.xlu0 %129 }
 0x191   :  { %v131_v24 = vadd.f32 %v130_v23, %v125_v22 }
 0x193   :  { %133 = vst.msk [vmem:[#allocation2] sm:$0xff] %vm36_vm2, %v131_v24 }
 0x19a   :  { %v150_v25 = vld [vmem:[#allocation2] sm:$0xff] }
 0x19b   :  { %199 = vlog2.f32 %v150_v25 }
 0x1a5   :  { %v200_v26 = vpop.eup %199 }
 0x1a6   :  { %v152_v27 = vmul.f32 0.6931472, %v200_v26 }
 0x1a8   :  { %v153_v28 = vadd.f32 10.0, %v152_v27 }
 0x1aa   :  { %v155_v29 = vsub.f32 %v153_v28, %v32_v9 }
 0x1ac   :  { %157 = vst.msk [vmem:[%s278_s3] sm:$0xff] %vm36_vm2, %v155_v29 }
 0x1ad   :  { %162 = vsyncpa [#allocation5], 1 }

</bundles_post_ra>
